<compile_context>
chip_gen: v6e
topology: v6e:2x2x1
jax: 0.10.0
libtpu: 0.0.40
codegen_flags: <defaults>
</compile_context>

<pallas_src>
import jax
import jax.numpy as jnp
from jax.experimental import pallas as pl
from jax.experimental.pallas import tpu as pltpu


def _round_up(n, m):
    return ((n + m - 1) // m) * m


def _vmem_ceiling_bytes():
    """Generation-aware ceiling for vmem_limit_bytes.

    ~100 MiB on v5e/v6e (128 MiB VMEM per TensorCore), ~54 MiB on v7x
    (64 MiB per TensorCore).  Conservative default is the v7x figure.
    """
    cap = None
    try:
        cap = int(getattr(pltpu.get_tpu_info(), "vmem_capacity_bytes", 0)) or None
    except Exception:
        cap = None
    if cap is None:
        try:
            kind = jax.devices()[0].device_kind.lower()
        except Exception:
            kind = ""
        cap = (128 << 20) if ("v5" in kind or "v6" in kind) else (64 << 20)
    return min(int(cap * 0.85), 100 << 20)


# ---------------------------------------------------------------------------
# Kernel
# ---------------------------------------------------------------------------
def _predictor_kernel(x_ref,
                      w1_ref, b1_ref,
                      w2_ref, b2_ref,
                      w3_ref, b3_ref,
                      w4_ref, b4_ref,
                      w5_ref, b5_ref,
                      o_ref, acc_ref):
    k = pl.program_id(1)

    @pl.when(k == 0)
    def _init():
        acc_ref[...] = jnp.zeros_like(acc_ref)

    # fc1, K-tiled over the input dim: stream (tk, d1) slabs of w1 so its HBM
    # DMA overlaps the MXU work; accumulate in f32 scratch.
    acc_ref[...] += jnp.dot(x_ref[...], w1_ref[...],
                            preferred_element_type=jnp.float32)

    @pl.when(k == pl.num_programs(1) - 1)
    def _finalize():
        cd = w2_ref.dtype  # bf16 MXU operand dtype

        h = acc_ref[...] + b1_ref[...]
        h = jnp.dot(h.astype(cd), w2_ref[...],
                    preferred_element_type=jnp.float32) + b2_ref[...]
        h = jnp.dot(h.astype(cd), w3_ref[...],
                    preferred_element_type=jnp.float32) + b3_ref[...]
        h = jnp.dot(h.astype(cd), w4_ref[...],
                    preferred_element_type=jnp.float32) + b4_ref[...]

        # F.normalize(x) = x / max(||x||_2, 1e-12) = x * rsqrt(max(sum(x^2), 1e-24)).
        # The per-row scale commutes with fc5's matmul, so apply it AFTER fc5:
        # XLU reduce + EUP rsqrt overlap with the fc5 MXU pushes, and the
        # rescale multiply runs at the narrower padded-num_class width.
        ssq = jnp.sum(h * h, axis=-1, keepdims=True)
        scale = jax.lax.rsqrt(jnp.maximum(ssq, 1e-24))

        # fc5 with 1/temp pre-folded into w5/b5; lane-dense (padded) output.
        out = jnp.dot(h.astype(cd), w5_ref[...],
                      preferred_element_type=jnp.float32)
        o_ref[...] = (scale * out + b5_ref[...]).astype(o_ref.dtype)


# ---------------------------------------------------------------------------
# Parameter handling
# ---------------------------------------------------------------------------
def init_params(key, inc, dims, num_class):
    """PyTorch nn.Linear default init: U(-1/sqrt(fan_in), 1/sqrt(fan_in)).

    Weights are returned pre-transposed to (in, out), f32 (module-faithful).
    """
    sizes = [inc] + list(dims) + [num_class]
    params = {}
    for idx in range(5):
        fan_in, fan_out = sizes[idx], sizes[idx + 1]
        key, kw, kb = jax.random.split(key, 3)
        bound = 1.0 / (fan_in ** 0.5)
        params[f"w{idx + 1}"] = jax.random.uniform(
            kw, (fan_in, fan_out), jnp.float32, -bound, bound)
        params[f"b{idx + 1}"] = jax.random.uniform(
            kb, (1, fan_out), jnp.float32, -bound, bound)
    return params


def prepare_params(params, *, temp, num_class, compute_dtype=jnp.bfloat16, lane=128):
    """One-time param prep: bf16 weights, f32 biases, 1/temp folded into fc5,
    fc1 input dim padded to a multiple of 128 (for K-tiling), fc5 output padded
    to a lane-dense width (multiple of 128)."""
    prep = {}

    # fc1: pad the input (K) dim so it can be K-tiled with a 128-multiple tk.
    # TODO(synk): optionally quantize w1/w2 to fp8 (v7x) or int8 (v5e) to halve
    # their HBM traffic / VMEM footprint; validate vs reference_exact first.
    w1 = params["w1"].astype(jnp.float32)
    inc = w1.shape[0]
    inc_p = _round_up(inc, lane)
    prep["w1"] = jnp.pad(w1, ((0, inc_p - inc), (0, 0))).astype(compute_dtype)
    prep["b1"] = params["b1"].astype(jnp.float32)

    for i in (2, 3, 4):
        prep[f"w{i}"] = params[f"w{i}"].astype(compute_dtype)
        prep[f"b{i}"] = params[f"b{i}"].astype(jnp.float32)

    # fc5: fold 1/temp, pad output to a lane-dense width -> unmasked stores.
    padded_nc = _round_up(num_class, lane)
    pad = padded_nc - num_class
    w5 = params["w5"].astype(jnp.float32) * (1.0 / temp)
    b5 = params["b5"].astype(jnp.float32) * (1.0 / temp)
    prep["w5"] = jnp.pad(w5, ((0, 0), (0, pad))).astype(compute_dtype)
    prep["b5"] = jnp.pad(b5, ((0, 0), (0, pad)))   # f32
    return prep


# ---------------------------------------------------------------------------
# Wrapper
# ---------------------------------------------------------------------------
def predictor_deep_forward(x, prep, *, num_class, tile_b=None, tk=None):
    """x: (B, inc) float array.  prep: dict from prepare_params()."""
    B, inc = x.shape
    inc_p, d1 = prep["w1"].shape
    padded_nc = prep["w5"].shape[1]
    compute_dtype = prep["w1"].dtype
    itemsize = jnp.dtype(compute_dtype).itemsize
    assert inc <= inc_p

    # ---- batch tile -------------------------------------------------------
    if tile_b is None:
        if B >= 256:
            tile_b = 256
            # Keep >= 2 batch tiles so the "parallel" axis can shard across
            # both v7x TensorCores; for a single 256-tile, halve to 128.
            if _round_up(B, tile_b) // tile_b < 2:
                tile_b = 128
        else:
            # Small batch: one tile, rounded to 16 rows (bf16 packs 16 rows
            # per sublane group -> no masked sublane handling).
            tile_b = _round_up(B, 16)
    tile_b = max(16, int(tile_b))

    # ---- K tile over fc1's input dim (streams w1) --------------------------
    if tk is None:
        for cand in (1024, 512, 256, 128):
            if inc_p % cand == 0:
                tk = cand
                break
    tk = int(tk)
    assert inc_p % tk == 0 and tk % 128 == 0, "tk must divide padded inc and be a multiple of 128"

    # ---- pad inputs ---------------------------------------------------------
    Bp = _round_up(B, tile_b)
    x_c = x.astype(compute_dtype)
    if Bp != B or inc_p != inc:
        x_c = jnp.pad(x_c, ((0, Bp - B), (0, inc_p - inc)))

    const_names = ("b1", "w2", "b2", "w3", "b3", "w4", "b4", "w5", "b5")
    consts = [prep[n] for n in const_names]

    # ---- VMEM budget (scales with tile_b / tk) ------------------------------
    const_bytes = sum(int(a.size) * a.dtype.itemsize for a in consts)
    w1_tile_bytes = tk * d1 * itemsize
    x_tile_bytes = tile_b * tk * itemsize
    out_tile_bytes = tile_b * padded_nc * 4
    acc_bytes = tile_b * d1 * 4
    widths = [int(prep[f"w{i}"].shape[1]) for i in range(1, 5)] + [padded_nc]
    act_bytes = tile_b * sum(widths) * 6       # f32 intermediate + bf16 recast per layer
    need = (2 * const_bytes                    # double-buffered constant blocks
            + 2 * w1_tile_bytes                # double-buffered streamed w1 slab
            + 2 * x_tile_bytes + 2 * out_tile_bytes
            + acc_bytes + act_bytes
            + (4 << 20))                       # compiler scratch headroom
    vmem_limit = int(min(max(need, 32 << 20), _vmem_ceiling_bytes()))

    # ---- cost estimate -------------------------------------------------------
    flops = 2 * Bp * sum(int(prep[f"w{i}"].shape[0]) * int(prep[f"w{i}"].shape[1])
                         for i in range(1, 6))
    bytes_accessed = (int(x_c.size) * itemsize
                      + int(prep["w1"].size) * itemsize + const_bytes
                      + Bp * padded_nc * 4)
    cost = pl.CostEstimate(flops=int(flops), transcendentals=int(Bp),
                           bytes_accessed=int(bytes_accessed))

    # ---- specs / call --------------------------------------------------------
    grid = (Bp // tile_b, inc_p // tk)

    in_specs = [pl.BlockSpec((tile_b, tk), lambda i, k: (i, k)),   # x (batch, k)
                pl.BlockSpec((tk, d1), lambda i, k: (k, 0))]       # w1 streamed over k
    in_specs += [pl.BlockSpec(a.shape, lambda i, k: (0, 0)) for a in consts]
    out_spec = pl.BlockSpec((tile_b, padded_nc), lambda i, k: (i, 0))

    out = pl.pallas_call(
        _predictor_kernel,
        out_shape=jax.ShapeDtypeStruct((Bp, padded_nc), jnp.float32),
        grid_spec=pltpu.PrefetchScalarGridSpec(
            num_scalar_prefetch=0,
            grid=grid,
            in_specs=in_specs,
            out_specs=out_spec,
            scratch_shapes=[pltpu.VMEM((tile_b, d1), jnp.float32)],
        ),
        compiler_params=pltpu.CompilerParams(
            dimension_semantics=("parallel", "arbitrary"),
            vmem_limit_bytes=vmem_limit,
        ),
        cost_estimate=cost,
    )(x_c, prep["w1"], *consts)

    return out[:B, :num_class]


# ---------------------------------------------------------------------------
# References
# ---------------------------------------------------------------------------
def reference_exact(x, params, temp):
    """Module-faithful f32 reference (fc1..fc4, F.normalize, fc5 / temp)."""
    h = x
    for i in range(1, 5):
        h = h @ params[f"w{i}"] + params[f"b{i}"]
    norm = jnp.sqrt(jnp.sum(h * h, axis=-1, keepdims=True))
    h = h / jnp.maximum(norm, 1e-12)
    return (h @ params["w5"] + params["b5"]) / temp


def reference_prepared(x, prep, num_class):
    """Pure-JAX reference with the same prepared (bf16, temp-folded) params and
    the same numerics as the kernel (scale applied after fc5)."""
    cd = prep["w1"].dtype
    inc = x.shape[1]
    h = jnp.dot(x.astype(cd), prep["w1"][:inc],
                preferred_element_type=jnp.float32) + prep["b1"]
    for i in (2, 3, 4):
        h = jnp.dot(h.astype(cd), prep[f"w{i}"],
                    preferred_element_type=jnp.float32) + prep[f"b{i}"]
    ssq = jnp.sum(h * h, axis=-1, keepdims=True)
    scale = jax.lax.rsqrt(jnp.maximum(ssq, 1e-24))
    out = scale * jnp.dot(h.astype(cd), prep["w5"],
                          preferred_element_type=jnp.float32) + prep["b5"]
    return out[:, :num_class]


# ---------------------------------------------------------------------------
# Demo
# ---------------------------------------------------------------------------
if __name__ == "__main__":
    # Funnel 4096->2048->1024->512->256->10 scaled down: 512->128->64->32->16->10.
    B = 24           # deliberately NOT a multiple of the tile -> exercises padding
    INC = 512
    DIMS = (128, 64, 32, 16)
    NUM_CLASS = 10
    TEMP = 0.05

    key = jax.random.PRNGKey(0)
    key, kx = jax.random.split(key)
    x = jax.random.normal(kx, (B, INC), dtype=jnp.float32)

    params = init_params(key, INC, DIMS, NUM_CLASS)
    prep = prepare_params(params, temp=TEMP, num_class=NUM_CLASS)

    # tile_b=16, tk=256 -> grid (2, 2): exercises both the batch zero-padding
    # path and the K-tiled fc1 accumulation path.
    out = predictor_deep_forward(x, prep, num_class=NUM_CLASS, tile_b=16, tk=256)
    out = jax.block_until_ready(out)
    assert out.shape == (B, NUM_CLASS)

    # Kernel vs. same-precision (bf16-params) reference: should match tightly.
    ref_same = reference_prepared(x, prep, NUM_CLASS)
    assert jnp.allclose(out, ref_same, atol=2e-2, rtol=2e-2), "mismatch vs bf16 reference"

    # Kernel vs. exact f32 module semantics: agreement at bf16 precision level.
    ref_exact = reference_exact(x, params, TEMP)
    rel = jnp.linalg.norm(out - ref_exact) / jnp.linalg.norm(ref_exact)
    assert float(rel) < 5e-2, f"relative error vs f32 reference too large: {float(rel)}"

    print("KERNEL_OK")
</pallas_src>

<mosaic_0001>
module attributes {stable_mosaic.version = 11 : i64} {
  func.func @_predictor_kernel(%arg0: i32, %arg1: i32, %arg2: memref<16x256xbf16, #tpu.memory_space<vmem>>, %arg3: memref<256x128xbf16, #tpu.memory_space<vmem>>, %arg4: memref<1x128xf32, #tpu.memory_space<vmem>>, %arg5: memref<128x64xbf16, #tpu.memory_space<vmem>>, %arg6: memref<1x64xf32, #tpu.memory_space<vmem>>, %arg7: memref<64x32xbf16, #tpu.memory_space<vmem>>, %arg8: memref<1x32xf32, #tpu.memory_space<vmem>>, %arg9: memref<32x16xbf16, #tpu.memory_space<vmem>>, %arg10: memref<1x16xf32, #tpu.memory_space<vmem>>, %arg11: memref<16x128xbf16, #tpu.memory_space<vmem>>, %arg12: memref<1x128xf32, #tpu.memory_space<vmem>>, %arg13: memref<16x128xf32, #tpu.memory_space<vmem>>, %arg14: memref<16x128xf32, #tpu.memory_space<vmem>>) attributes {dimension_semantics = [#tpu.dimension_semantics<parallel>, #tpu.dimension_semantics<arbitrary>], iteration_bounds = array<i64: 2, 2>, scalar_prefetch = 0 : i64, scratch_operands = 1 : i64, tpu.core_type = #tpu.core_type<tc>, window_params = [{transform_indices = @transform_0, window_bounds = array<i64: 16, 256>}, {transform_indices = @transform_1, window_bounds = array<i64: 256, 128>}, {pipeline_mode = #tpu.pipeline_mode<synchronous>, transform_indices = @transform_2, window_bounds = array<i64: 1, 128>}, {pipeline_mode = #tpu.pipeline_mode<synchronous>, transform_indices = @transform_3, window_bounds = array<i64: 128, 64>}, {pipeline_mode = #tpu.pipeline_mode<synchronous>, transform_indices = @transform_4, window_bounds = array<i64: 1, 64>}, {pipeline_mode = #tpu.pipeline_mode<synchronous>, transform_indices = @transform_5, window_bounds = array<i64: 64, 32>}, {pipeline_mode = #tpu.pipeline_mode<synchronous>, transform_indices = @transform_6, window_bounds = array<i64: 1, 32>}, {pipeline_mode = #tpu.pipeline_mode<synchronous>, transform_indices = @transform_7, window_bounds = array<i64: 32, 16>}, {pipeline_mode = #tpu.pipeline_mode<synchronous>, transform_indices = @transform_8, window_bounds = array<i64: 1, 16>}, {pipeline_mode = #tpu.pipeline_mode<synchronous>, transform_indices = @transform_9, window_bounds = array<i64: 16, 128>}, {pipeline_mode = #tpu.pipeline_mode<synchronous>, transform_indices = @transform_10, window_bounds = array<i64: 1, 128>}, {transform_indices = @transform_11, window_bounds = array<i64: 16, 128>}]} {
    %c0_i32 = arith.constant 0 : i32
    %0 = arith.cmpi eq, %arg1, %c0_i32 : i32
    %1 = arith.extui %0 : i1 to i32
    %c0_i32_0 = arith.constant 0 : i32
    %2 = arith.cmpi ne, %1, %c0_i32_0 : i32
    scf.if %2 {
      %cst_9 = arith.constant 0.000000e+00 : f32
      %12 = vector.broadcast %cst_9 : f32 to vector<16x128xf32>
      %c0_10 = arith.constant 0 : index
      %c0_11 = arith.constant 0 : index
      %13 = vector.load %arg14[%c0_10, %c0_11] : memref<16x128xf32, #tpu.memory_space<vmem>>, vector<16x128xf32>
      tpu.vector_store %arg14[%c0_10, %c0_11], %12 {strides = array<i32>} : memref<16x128xf32, #tpu.memory_space<vmem>>, vector<16x128xf32>,
    } else {
    }
    %c0 = arith.constant 0 : index
    %c0_1 = arith.constant 0 : index
    %3 = vector.load %arg14[%c0, %c0_1] : memref<16x128xf32, #tpu.memory_space<vmem>>, vector<16x128xf32>
    %c0_2 = arith.constant 0 : index
    %c0_3 = arith.constant 0 : index
    %4 = vector.load %arg2[%c0_2, %c0_3] : memref<16x256xbf16, #tpu.memory_space<vmem>>, vector<16x256xbf16>
    %c0_4 = arith.constant 0 : index
    %c0_5 = arith.constant 0 : index
    %5 = vector.load %arg3[%c0_4, %c0_5] : memref<256x128xbf16, #tpu.memory_space<vmem>>, vector<256x128xbf16>
    %cst = arith.constant dense<0.000000e+00> : vector<16x128xf32>
    %6 = tpu.matmul %4, %5, %cst {dimension_numbers = #tpu.dot_dimension_numbers<[1], [0], [0], [1], [0, 0, 1, 1], [], []>} : vector<16x256xbf16>, vector<256x128xbf16>, vector<16x128xf32> -> vector<16x128xf32>
    %7 = arith.addf %3, %6 : vector<16x128xf32>
    %c0_6 = arith.constant 0 : index
    %c0_7 = arith.constant 0 : index
    %8 = vector.load %arg14[%c0_6, %c0_7] : memref<16x128xf32, #tpu.memory_space<vmem>>, vector<16x128xf32>
    tpu.vector_store %arg14[%c0_6, %c0_7], %7 {strides = array<i32>} : memref<16x128xf32, #tpu.memory_space<vmem>>, vector<16x128xf32>,
    %c1_i32 = arith.constant 1 : i32
    %9 = arith.cmpi eq, %arg1, %c1_i32 : i32
    %10 = arith.extui %9 : i1 to i32
    %c0_i32_8 = arith.constant 0 : i32
    %11 = arith.cmpi ne, %10, %c0_i32_8 : i32
    scf.if %11 {
      %c0_9 = arith.constant 0 : index
      %c0_10 = arith.constant 0 : index
      %12 = vector.load %arg14[%c0_9, %c0_10] : memref<16x128xf32, #tpu.memory_space<vmem>>, vector<16x128xf32>
      %c0_11 = arith.constant 0 : index
      %c0_12 = arith.constant 0 : index
      %13 = vector.load %arg4[%c0_11, %c0_12] : memref<1x128xf32, #tpu.memory_space<vmem>>, vector<1x128xf32>
      %14 = vector.broadcast %13 : vector<1x128xf32> to vector<16x128xf32>
      %15 = arith.addf %12, %14 : vector<16x128xf32>
      %16 = arith.truncf %15 : vector<16x128xf32> to vector<16x128xbf16>
      %c0_13 = arith.constant 0 : index
      %c0_14 = arith.constant 0 : index
      %17 = vector.load %arg5[%c0_13, %c0_14] : memref<128x64xbf16, #tpu.memory_space<vmem>>, vector<128x64xbf16>
      %cst_15 = arith.constant dense<0.000000e+00> : vector<16x64xf32>
      %18 = tpu.matmul %16, %17, %cst_15 {dimension_numbers = #tpu.dot_dimension_numbers<[1], [0], [0], [1], [0, 0, 1, 1], [], []>} : vector<16x128xbf16>, vector<128x64xbf16>, vector<16x64xf32> -> vector<16x64xf32>
      %c0_16 = arith.constant 0 : index
      %c0_17 = arith.constant 0 : index
      %19 = vector.load %arg6[%c0_16, %c0_17] : memref<1x64xf32, #tpu.memory_space<vmem>>, vector<1x64xf32>
      %20 = vector.broadcast %19 : vector<1x64xf32> to vector<16x64xf32>
      %21 = arith.addf %18, %20 : vector<16x64xf32>
      %22 = arith.truncf %21 : vector<16x64xf32> to vector<16x64xbf16>
      %c0_18 = arith.constant 0 : index
      %c0_19 = arith.constant 0 : index
      %23 = vector.load %arg7[%c0_18, %c0_19] : memref<64x32xbf16, #tpu.memory_space<vmem>>, vector<64x32xbf16>
      %cst_20 = arith.constant dense<0.000000e+00> : vector<16x32xf32>
      %24 = tpu.matmul %22, %23, %cst_20 {dimension_numbers = #tpu.dot_dimension_numbers<[1], [0], [0], [1], [0, 0, 1, 1], [], []>} : vector<16x64xbf16>, vector<64x32xbf16>, vector<16x32xf32> -> vector<16x32xf32>
      %c0_21 = arith.constant 0 : index
      %c0_22 = arith.constant 0 : index
      %25 = vector.load %arg8[%c0_21, %c0_22] : memref<1x32xf32, #tpu.memory_space<vmem>>, vector<1x32xf32>
      %26 = vector.broadcast %25 : vector<1x32xf32> to vector<16x32xf32>
      %27 = arith.addf %24, %26 : vector<16x32xf32>
      %28 = arith.truncf %27 : vector<16x32xf32> to vector<16x32xbf16>
      %c0_23 = arith.constant 0 : index
      %c0_24 = arith.constant 0 : index
      %29 = vector.load %arg9[%c0_23, %c0_24] : memref<32x16xbf16, #tpu.memory_space<vmem>>, vector<32x16xbf16>
      %cst_25 = arith.constant dense<0.000000e+00> : vector<16x16xf32>
      %30 = tpu.matmul %28, %29, %cst_25 {dimension_numbers = #tpu.dot_dimension_numbers<[1], [0], [0], [1], [0, 0, 1, 1], [], []>} : vector<16x32xbf16>, vector<32x16xbf16>, vector<16x16xf32> -> vector<16x16xf32>
      %c0_26 = arith.constant 0 : index
      %c0_27 = arith.constant 0 : index
      %31 = vector.load %arg10[%c0_26, %c0_27] : memref<1x16xf32, #tpu.memory_space<vmem>>, vector<1x16xf32>
      %32 = vector.broadcast %31 : vector<1x16xf32> to vector<16x16xf32>
      %33 = arith.addf %30, %32 : vector<16x16xf32>
      %34 = arith.mulf %33, %33 : vector<16x16xf32>
      %cst_28 = arith.constant dense<0.000000e+00> : vector<16xf32>
      %35 = vector.multi_reduction <add>, %34, %cst_28 [1] : vector<16x16xf32> to vector<16xf32>
      %36 = vector.shape_cast %35 : vector<16xf32> to vector<16x1xf32>
      %cst_29 = arith.constant 1.000000e-24 : f32
      %37 = vector.broadcast %cst_29 : f32 to vector<16x1xf32>
      %38 = arith.maximumf %36, %37 : vector<16x1xf32>
      %39 = math.rsqrt %38 : vector<16x1xf32>
      %40 = arith.truncf %33 : vector<16x16xf32> to vector<16x16xbf16>
      %c0_30 = arith.constant 0 : index
      %c0_31 = arith.constant 0 : index
      %41 = vector.load %arg11[%c0_30, %c0_31] : memref<16x128xbf16, #tpu.memory_space<vmem>>, vector<16x128xbf16>
      %cst_32 = arith.constant dense<0.000000e+00> : vector<16x128xf32>
      %42 = tpu.matmul %40, %41, %cst_32 {dimension_numbers = #tpu.dot_dimension_numbers<[1], [0], [0], [1], [0, 0, 1, 1], [], []>} : vector<16x16xbf16>, vector<16x128xbf16>, vector<16x128xf32> -> vector<16x128xf32>
      %43 = vector.broadcast %39 : vector<16x1xf32> to vector<16x128xf32>
      %44 = arith.mulf %43, %42 : vector<16x128xf32>
      %c0_33 = arith.constant 0 : index
      %c0_34 = arith.constant 0 : index
      %45 = vector.load %arg12[%c0_33, %c0_34] : memref<1x128xf32, #tpu.memory_space<vmem>>, vector<1x128xf32>
      %46 = vector.broadcast %45 : vector<1x128xf32> to vector<16x128xf32>
      %47 = arith.addf %44, %46 : vector<16x128xf32>
      %c0_35 = arith.constant 0 : index
      %c0_36 = arith.constant 0 : index
      %48 = vector.load %arg13[%c0_35, %c0_36] : memref<16x128xf32, #tpu.memory_space<vmem>>, vector<16x128xf32>
      tpu.vector_store %arg13[%c0_35, %c0_36], %47 {strides = array<i32>} : memref<16x128xf32, #tpu.memory_space<vmem>>, vector<16x128xf32>,
    } else {
    }
    return
  }
  func.func @transform_0(%arg0: i32, %arg1: i32) -> (i32, i32) {
    %c0_i32 = arith.constant 0 : i32
    return %arg0, %arg1 : i32, i32
  }
  func.func @transform_1(%arg0: i32, %arg1: i32) -> (i32, i32) {
    %c0_i32 = arith.constant 0 : i32
    %c0_i32_0 = arith.constant 0 : i32
    return %arg1, %c0_i32 : i32, i32
  }
  func.func @transform_2(%arg0: i32, %arg1: i32) -> (i32, i32) {
    %c0_i32 = arith.constant 0 : i32
    %c0_i32_0 = arith.constant 0 : i32
    %c0_i32_1 = arith.constant 0 : i32
    return %c0_i32, %c0_i32_0 : i32, i32
  }
  func.func @transform_3(%arg0: i32, %arg1: i32) -> (i32, i32) {
    %c0_i32 = arith.constant 0 : i32
    %c0_i32_0 = arith.constant 0 : i32
    %c0_i32_1 = arith.constant 0 : i32
    return %c0_i32, %c0_i32_0 : i32, i32
  }
  func.func @transform_4(%arg0: i32, %arg1: i32) -> (i32, i32) {
    %c0_i32 = arith.constant 0 : i32
    %c0_i32_0 = arith.constant 0 : i32
    %c0_i32_1 = arith.constant 0 : i32
    return %c0_i32, %c0_i32_0 : i32, i32
  }
  func.func @transform_5(%arg0: i32, %arg1: i32) -> (i32, i32) {
    %c0_i32 = arith.constant 0 : i32
    %c0_i32_0 = arith.constant 0 : i32
    %c0_i32_1 = arith.constant 0 : i32
    return %c0_i32, %c0_i32_0 : i32, i32
  }
  func.func @transform_6(%arg0: i32, %arg1: i32) -> (i32, i32) {
    %c0_i32 = arith.constant 0 : i32
    %c0_i32_0 = arith.constant 0 : i32
    %c0_i32_1 = arith.constant 0 : i32
    return %c0_i32, %c0_i32_0 : i32, i32
  }
  func.func @transform_7(%arg0: i32, %arg1: i32) -> (i32, i32) {
    %c0_i32 = arith.constant 0 : i32
    %c0_i32_0 = arith.constant 0 : i32
    %c0_i32_1 = arith.constant 0 : i32
    return %c0_i32, %c0_i32_0 : i32, i32
  }
  func.func @transform_8(%arg0: i32, %arg1: i32) -> (i32, i32) {
    %c0_i32 = arith.constant 0 : i32
    %c0_i32_0 = arith.constant 0 : i32
    %c0_i32_1 = arith.constant 0 : i32
    return %c0_i32, %c0_i32_0 : i32, i32
  }
  func.func @transform_9(%arg0: i32, %arg1: i32) -> (i32, i32) {
    %c0_i32 = arith.constant 0 : i32
    %c0_i32_0 = arith.constant 0 : i32
    %c0_i32_1 = arith.constant 0 : i32
    return %c0_i32, %c0_i32_0 : i32, i32
  }
  func.func @transform_10(%arg0: i32, %arg1: i32) -> (i32, i32) {
    %c0_i32 = arith.constant 0 : i32
    %c0_i32_0 = arith.constant 0 : i32
    %c0_i32_1 = arith.constant 0 : i32
    return %c0_i32, %c0_i32_0 : i32, i32
  }
  func.func @transform_11(%arg0: i32, %arg1: i32) -> (i32, i32) {
    %c0_i32 = arith.constant 0 : i32
    %c0_i32_0 = arith.constant 0 : i32
    return %arg0, %c0_i32 : i32, i32
  }
}

</mosaic_0001>

<bundles_post_ra>
// kernel: tpu_custom_call.1
= control target key start
LH: loop header
LB: loop body
LE: loop exit
PB: predicated region body
PF: predicated region fallthrough
CT: control target
= control target key end

     0   :  { %s2058_s0 = inlined_call_operand.vmem [shape: bf16[32,512], index: 0, kind: input, shape index: {}]   ;;  %s2059_s1 = inlined_call_operand.hbm [shape: bf16[512,128], index: 1, kind: input, shape index: {}]   ;;  %s2060_s2 = inlined_call_operand.vmem [shape: f32[1,128], index: 2, kind: input, shape index: {}]   ;;  %s2061_s3 = inlined_call_operand.vmem [shape: bf16[128,64], index: 3, kind: input, shape index: {}]   ;;  %s2062_s4 = inlined_call_operand.vmem [shape: f32[1,64], index: 4, kind: input, shape index: {}]   ;;  %s2063_s5 = inlined_call_operand.vmem [shape: bf16[64,32], index: 5, kind: input, shape index: {}]   ;;  %s2064_s6 = inlined_call_operand.vmem [shape: f32[1,32], index: 6, kind: input, shape index: {}]   ;;  %s2065_s7 = inlined_call_operand.vmem [shape: bf16[32,16], index: 7, kind: input, shape index: {}]   ;;  %s2066_s8 = inlined_call_operand.vmem [shape: f32[1,16], index: 8, kind: input, shape index: {}]   ;;  %s2067_s9 = inlined_call_operand.vmem [shape: bf16[16,128], index: 9, kind: input, shape index: {}]   ;;  %s2068_s10 = inlined_call_operand.vmem [shape: f32[1,128], index: 10, kind: input, shape index: {}]   ;;  %s2069_s11 = inlined_call_operand.hbm [shape: f32[32,128], index: 11, kind: output, shape index: {}]  }
   0x1   :  { %2078 = sst [smem:[#allocation20_spill]] %s2064_s6 }
   0x2   :  { %2079 = sst [smem:[#allocation21_spill]] %s2065_s7 }
   0x3   :  { %2080 = sst [smem:[#allocation22_spill]] %s2066_s8 }
   0x4   :  { %2081 = sst [smem:[#allocation23_spill]] %s2067_s9 }
   0x5   :  { %2082 = sst [smem:[#allocation24_spill]] %s2068_s10 }
   0x6   :  { %2083 = sst [smem:[#allocation25_spill]] %s2069_s11 }
   0x7   :  { %16 = vsyncpa [#allocation5], 0 }
   0x8   :  { %18 = vsyncpa [#allocation5 + $0x1], 0 }
   0x9   :  { %19 = vsyncpa [#allocation6], 0 }
   0xa   :  { %21 = vsyncpa [#allocation6 + $0x1], 0  ;;  %s1705_s17 = smov 0   ;;  %s1707_s18 = smov 0  }
   0xb   :  { %s1709_s19 = smov 0   ;;  %s1711_s20 = smov 0  }
   0xc   :  { %s1713_s21 = smov 0   ;;  %s1715_s22 = smov 0  }
   0xd   :  { %s1717_s23 = smov 0   ;;  %s1719_s24 = smov 0  }
   0xe   :  { %s1721_s25 = smov 0   ;;  %s1723_s26 = smov 0  }
   0xf   :  { %s1725_s27 = smov 0   ;;  %s1727_s28 = smov 0  }
  0x10   :  { %s1729_s29 = smov 0  }
  0x11 LB: > { %2084 = sst [smem:[#allocation10_spill]] %s1594_s19  ;;  %s36_s13 = sadd.s32 1, %s1626_s27  ;;  %s1634_s29 = sphi %s1729_s29, %s27_s29   ;;  %s1630_s28 = sphi %s1727_s28, %s2127_s28   ;;  %s1626_s27 = sphi %s1725_s27, %s2126_s27   ;;  %s1622_s26 = sphi %s1723_s26, %s2117_s26   ;;  %s1618_s25 = sphi %s1721_s25, %s2125_s25   ;;  %s1614_s24 = sphi %s1719_s24, %s2116_s24   ;;  %s1610_s23 = sphi %s1717_s23, %s2115_s23   ;;  %s1606_s22 = sphi %s1715_s22, %s2124_s22   ;;  %s1602_s21 = sphi %s1713_s21, %s2123_s21   ;;  %s1598_s20 = sphi %s1711_s20, %s2122_s20   ;;  %s1594_s19 = sphi %s1709_s19, %s2113_s19   ;;  %s1590_s18 = sphi %s1707_s18, %s2121_s18   ;;  %s1586_s17 = sphi %s1705_s17, %s2120_s17  }
  0x12   : > { %2085 = sst [smem:[#allocation11_spill]] %s1614_s24  ;;  %s39_s14 = sadd.s32 1, %s1630_s28 }
  0x13   : > { %2086 = sst [smem:[#allocation12_spill]] %s1622_s26  ;;  %p37_p0 = scmp.ge.s32.totalorder %s36_s13, 2 }
  0x14   : > { %2087 = sst [smem:[#allocation13_spill]] %s1630_s28  ;;  %s48_s15 = sadd.s32 1, %s1614_s24 }
  0x15   : > { %p55_p1 = scmp.ne.s32.totalorder %s1614_s24, %s1610_s23  ;;  %p56_p2 = scmp.eq.s32.totalorder %s1634_s29, 0 }
  0x16   : > { %s2129_s13 = smov (%p37_p0, %s36_s13), 0  ;;  %s2131_s14 = smov (!%p37_p0, %s39_s14), %s1630_s28 }
  0x17   : > { %2088 = sst [smem:[#allocation14_spill]] %s2129_s13  ;;  %s44_s16 = ssub.s32 %s1626_s27, %s2129_s13 }
  0x18   : > { %p1783_p3 = por %p56_p2, %p55_p1  ;;  %p41_p4 = scmp.ge.s32.totalorder %s2131_s14, 2 }
  0x19   : > { %p72_p5 = scmp.eq.s32.totalorder %s44_s16, 0  ;;  %s74_s30 = sadd.s32 1, %s1606_s22 }
  0x1a   : > { %p81_p6 = scmp.ne.s32.totalorder %s1606_s22, %s1602_s21  ;;  %s2133_s14 = smov (%p41_p4, %s2131_s14), 0 }
  0x1b   : > { %2090 = sst [smem:[#allocation15_spill]] %s2133_s14  ;;  %s43_s11 = ssub.s32 %s1630_s28, %s2133_s14 }
  0x1c   : > { %s1793_s13 = scalar_select %p72_p5, %s1606_s22, %s74_s30  }
  0x1d   : > { %p1797_p7 = por %p81_p6, %p56_p2  ;;  %s45_s10 = sor.u32 %s44_s16, %s43_s11 }
  0x1e   : > { %2091 = sst [smem:[#allocation16_spill]] %s1793_s13  ;;  %p87_p8 = scmp.ne.s32.totalorder %s1602_s21, %s1598_s20 }
  0x1f   : > { %p46_p9 = scmp.eq.s32.totalorder %s45_s10, 0  ;;  %s2093_s8 = sadd.s32 4294967295, %s1634_s29  }
  0x20   : > { %p88_p10 = scmp.eq.s32.totalorder %s2093_s8, 0  ;;  %p287_p11 = scmp.eq.s32.totalorder %s43_s11, 0 }
  0x21   : > { %s289_s9 = sadd.s32 1, %s1594_s19  ;;  %p299_p13 = scmp.ne.s32.totalorder %s1594_s19, %s1590_s18 }
  0x22   : > { %s1807_s6 = scalar_select %p46_p9, %s1614_s24, %s48_s15  }
  0x23   : > { %p1809_p12 = por %p88_p10, %p87_p8  ;;  %s2097_s14 = smov %s2093_s8 }
  0x24   : > { %2094 = sst [smem:[#allocation17_spill]] %s1807_s6  ;;  %p300_p0 = scmp.eq.s32.totalorder %s2097_s14, 3 }
  0x25   : > { %s1816_s30 = scalar_select %p287_p11, %s1594_s19, %s289_s9  }
  0x26   : > { %p305_p1 = scmp.ne.s32.totalorder %s1590_s18, %s1586_s17  ;;  %s2098_s13 = sadd.s32 4294967294, %s1634_s29  }
  0x27   : > { %2096 = sst [smem:[#allocation18_spill]] %s1816_s30  ;;  %p306_p2 = scmp.eq.s32.totalorder %s2098_s13, 3 }
  0x28   : > { %p1824_p4 = por %p300_p0, %p299_p13  ;;  %p1163_p6 = scmp.ge.s32.totalorder %s1634_s29, 4 }
  0x29   : > { %p1828_p5 = por %p306_p2, %p305_p1 }
  0x2a   : > { %349 = sbr.rel (%p1163_p6) target bundleno = 71 (0x47), region = 52 }
  0x2b   : > { %s2100_s8 = scalar_select %p1828_p5, 1, 0 }
  0x2d   : > { %2101 = sst [smem:[#allocation19_spill]] %s2100_s8 }
  0x2f   : > { %352 = sbr.rel (!%p1783_p3) target bundleno = 55 (0x37), region = 56  ;;  %s354_s9 = sand.u32 (%p1783_p3), 1, %s1614_s24  }
  0x30   : > { %s1166_s11 = sshll.u32 (%p1783_p3), %s1626_s27, 1  ;;  %s1164_s20 = sshll.u32 (%p1783_p3), %s354_s9, 4 }
  0x31   : > { %s1224_s13 = sshll.u32 (%p1783_p3), %s1630_s28, 3  ;;  %s356_s19 = scalar_lea.vmem (%p1783_p3), [#allocation3], %s1164_s20 }
  0x32   : > { %s360_s14 = sadd.s32 (%p1783_p3), %s1224_s13, %s1166_s11 }
  0x33   : > { %s1168_s15 = sshll.u32 (%p1783_p3), %s360_s14, 2 }
  0x34   : > { %s362_s30 = scalar_lea.vmem %s2058_s0, %s1168_s15 }
  0x35   : > { %v393_v0 = vld [vmem:[%s362_s30] sm:$0xff]  ;;  %v395_v1 = vld [vmem:[%s362_s30 + $0x10] sm:$0xff] }
  0x36   : > { %394 = vst [vmem:[%s356_s19] sm:$0xff] %v393_v0  ;;  %396 = vst [vmem:[%s356_s19 + $0x8] sm:$0xff] %v395_v1 }
  0x37 PF: > { %s403_s12 = sand.u32 1, %s1606_s22   ;;  %s1225_s24 = sshll.u32 %s1626_s27, 11 }
  0x38   : > { %s1169_s8 = sshll.u32 %s403_s12, 7  ;;  %s413_s11 = scalar_lea.hbm %s2059_s1, %s1225_s24 }
  0x39   : > { %s407_s13 = scalar_lea.vmem [#allocation4], %s1169_s8  ;;  %s404_s6 = scalar_lea.sflag [#allocation5], %s403_s12 }
  0x3a   : > { %s414_s14 = sshll.u32 %s407_s13, 4  ;;  %s1636_s19 = smov [#allocation4]   ;;  %s415_s14 = int_to_ptr.vmem [resolvable:$true] %s414_s14 }
  0x3b   : > { %s1484_s15 = scalar_lea.vmem %s415_s14, 2048  ;;  %s1488_s30 = sshll.u32 %s1636_s19, 4  ;;  %s1489_s30 = int_to_ptr.vmem [resolvable:$false] %s1488_s30 }
  0x3c   : > { %p1485_p3 = scmp.ne.s32.totalorder %s415_s14, %s1484_s15  ;;  %s1490_s20 = scalar_lea.vmem %s1489_s30, 4096 }
  0x3d   : > { %p1491_p10 = scmp.lt.s32.totalorder %s415_s14, %s1489_s30  ;;  %p1492_p11 = scmp.lt.s32.totalorder %s1490_s20, %s1484_s15 }
  0x3e   : > { %p1486_p8 = pnand %p1485_p3, %p1797_p7 }
  0x3f   : > { %p1493_p13 = por %p1492_p11, %p1491_p10 }
  0x40   : > { %p1487_p9 = pneg %p1486_p8 }
  0x42   : > { %p1494_p0 = pnand %p1493_p13, %p1487_p9 }
  0x44   : > { %1497 = shalt.err (!%p1494_p0)
}
  0x45   : > { %s1637_s28 = smov 64   ;;  %s1638_s24 = smov 4  }
  0x46   : > { %1314 = dma.hbm_to_vmem [thread:$0]  (%p1797_p7), %s413_s11, 2048, %s415_s14, %s404_s6, %s1637_s28, %s1637_s28, %s1638_s24  }
  0x47 PF: > { %p1172_p1 = scmp.ge.s32.totalorder %s1634_s29, 1  ;;  %p422_p2 = scmp.lt.s32.totalorder %s1634_s29, 5 }
  0x49   : > { %p423_p6 = pnand %p1172_p1, %p422_p2 }
  0x4a   : > { %s429_s8 = sand.u32 (!%p423_p6), 1, %s1610_s23   ;;  %s435_s16 = sand.u32 (!%p423_p6), 1, %s1602_s21  }
  0x4b   : > { %426 = sbr.rel (%p423_p6) target bundleno = 1190 (0x4a6), region = 98  ;;  %s1854_s12 = sshll.u32 (!%p423_p6), %s429_s8, 4 }
  0x4c   : > { %s1174_s9 = sshll.u32 (!%p423_p6), %s435_s16, 7  ;;  %s431_s13 = scalar_lea.vmem (!%p423_p6), [#allocation3], %s1854_s12 }
  0x4d   : > { %s436_s15 = scalar_lea.sflag (!%p423_p6), [#allocation5], %s435_s16  ;;  %s1857_s26 = scalar_lea.vmem (!%p423_p6), [#allocation4], %s1174_s9 }
  0x50   : > { %1577 = dma.done.wait (%p1809_p12), %s436_s15, 2048  }
  0x51   : > { %1579 = vsyncadd (%p1809_p12), %s436_s15, 4294965248  ;;  %s479_s11 = sand.u32 1, %s1590_s18   ;;  %p1176_p7 = scmp.ne.s32.totalorder %s1618_s25, 0 }
  0x52   : > { %s1175_s14 = sshll.u32 %s479_s11, 4 }
  0x53   : > { %s1866_s23 = scalar_lea.vmem [#allocation7], %s1175_s14  ;;  %490 = sbr.rel (%p1176_p7) target bundleno = 90 (0x5a), region = 110 }
  0x58   : > { %v1639_v2 = vmov 0.0  }
  0x59   : > { %491 = vst [vmem:[#allocation2] sm:$0xff] %v1639_v2  ;;  %492 = vst [vmem:[#allocation2 + $0x8] sm:$0xff] %v1639_v2 }
  0x5a PF: > { %v1434_v3 = vld [vmem:[%s1857_s26 + $0x78] sm:$0xff]   ;;  %v1436_v5 = vld [vmem:[%s1857_s26 + $0x70] sm:$0xff]   ;;  %v1438_v7 = vld [vmem:[%s1857_s26 + $0x68] sm:$0xff]   ;;  %p1195_p12 = scmp.ne.s32.totalorder %s1618_s25, 1 }
  0x5b   : > { %v1435_v4 = vld [vmem:[%s1857_s26 + $0x38] sm:$0xff]   ;;  %1227 = vmatprep.subr.bf16.mxu0 %v1434_v3  ;;  %v1437_v6 = vld [vmem:[%s1857_s26 + $0x30] sm:$0xff]   ;;  %v1439_v8 = vld [vmem:[%s1857_s26 + $0x28] sm:$0xff]   ;;  %s2104_s25 = sld [smem:[#allocation20_spill]] (!%p1195_p12) }
  0x5c   : > { %1228 = vmatpush3.bf16.msra.mxu0 %v1435_v4  ;;  %v1440_v9 = vld [vmem:[%s1857_s26 + $0x60] sm:$0xff]   ;;  %v1442_v11 = vld [vmem:[%s1857_s26 + $0x58] sm:$0xff]   ;;  %v1444_v13 = vld [vmem:[%s1857_s26 + $0x50] sm:$0xff]   ;;  %s2105_s24 = sld [smem:[#allocation23_spill]] (!%p1195_p12) }
  0x5d   : > { %1229 = vmatprep.subr.bf16.mxu0 %v1436_v5  ;;  %v1441_v10 = vld [vmem:[%s1857_s26 + $0x20] sm:$0xff]   ;;  %v1443_v12 = vld [vmem:[%s1857_s26 + $0x18] sm:$0xff]   ;;  %v1445_v15 = vld [vmem:[%s1857_s26 + $0x10] sm:$0xff]   ;;  %s2106_s12 = sld [smem:[#allocation22_spill]] (!%p1195_p12) }
  0x5e   : > { %v1452_v14 = vld [vmem:[%s431_s13 + $0x4] ss:$8 sps:$4 sm:$0xff]   ;;  %v1450_v20 = vld [vmem:[%s431_s13] ss:$8 sps:$4 sm:$0xff]   ;;  %s2107_s15 = sld [smem:[#allocation24_spill]] (!%p1195_p12) }
  0x5f   : > { %667 = vmatprep.mubr.bf16.mxu0 %v1452_v14  ;;  %v1446_v16 = vld [vmem:[%s1857_s26 + $0x48] sm:$0xff]   ;;  %v1448_v18 = vld [vmem:[%s1857_s26 + $0x40] sm:$0xff]  }
  0x60   : > { %1230 = vmatpush3.bf16.msra.mxu0 %v1437_v6  ;;  %v1447_v17 = vld [vmem:[%s1857_s26 + $0x8] sm:$0xff]   ;;  %v1449_v19 = vld [vmem:[%s1857_s26] sm:$0xff]   ;;  %v493_v22 = vld [vmem:[#allocation2] sm:$0xff]  ;;  %s2102_s26 = sld [smem:[#allocation21_spill]] (!%p1195_p12) }
  0x61   : > { %1231 = vmatprep.subr.bf16.mxu0 %v1438_v7  ;;  %v494_v27 = vld [vmem:[#allocation2 + $0x8] sm:$0xff] }
  0x64   : > { %1232 = vmatpush3.bf16.msra.mxu0 %v1439_v8 }
  0x65   : > { %1233 = vmatprep.subr.bf16.mxu0 %v1440_v9 }
  0x66   : > { %s2103_s14 = smov (!%p1195_p12), %s2102_s26 }
  0x68   : > { %1234 = vmatpush3.bf16.msra.mxu0 %v1441_v10 }
  0x69   : > { %1235 = vmatprep.subr.bf16.mxu0 %v1442_v11 }
  0x6c   : > { %1236 = vmatpush3.bf16.msra.mxu0 %v1443_v12 }
  0x6d   : > { %1237 = vmatprep.subr.bf16.mxu0 %v1444_v13 }
  0x70   : > { %1238 = vmatpush3.bf16.msra.mxu0 %v1445_v15 }
  0x71   : > { %1239 = vmatprep.subr.bf16.mxu0 %v1446_v16 }
  0x74   : > { %1240 = vmatpush3.bf16.msra.mxu0 %v1447_v17 }
  0x75   : > { %1241 = vmatprep.subr.bf16.mxu0 %v1448_v18 }
  0x78   : > { %1242 = vmatpush3.bf16.msra.mxu0 %v1449_v19 }
  0x7b   : > { %668 = vmatmul.mubr.bf16.vlgmr.msra.gmra.mxu0 %v1450_v20 }
 0x13b   : > { %v1243_v21 = vpop.f32.mrf.mxu0 }
 0x13d   : > { %v1244_v23 = vpop.f32.mrf.mxu0 }
 0x13e   : > { %v1245_v24 = vadd.f32 %v1244_v23, %v1243_v21 }
 0x13f   : > { %v1246_v25 = vpop.f32.mrf.mxu0 }
 0x140   : > { %v676_v26 = vadd.f32 %v1245_v24, %v493_v22 }
 0x141   : > { %v1247_v28 = vpop.f32.mrf.mxu0 }
 0x142   : > { %678 = vst [vmem:[#allocation2] sm:$0xff] %v676_v26  ;;  %v1248_v29 = vadd.f32 %v1247_v28, %v1246_v25  ;;  %683 = sbr.rel (%p1195_p12) target bundleno = 1165 (0x48d), region = 114 }
 0x144   : > { %v677_v30 = vadd.f32 %v1248_v29, %v494_v27 }
 0x146   : > { %679 = vst [vmem:[#allocation2 + $0x8] sm:$0xff] %v677_v30 }
 0x147   : > { %v1453_v31 = vld [vmem:[%s2061_s3 + $0x38] sm:$0xff]   ;;  %v1640_v32 = vmov 0.0   ;;  %v1454_v33 = vld [vmem:[%s2061_s3 + $0x30] sm:$0xff]   ;;  %vm1641_vm0 = vmmov 0   ;;  %v1455_v34 = vld [vmem:[%s2061_s3 + $0x28] sm:$0xff]   ;;  %vm848_vm1 = vcmask 523264  }
 0x148   : > { %1268 = vmatprep.subr.bf16.mxu0 %v1640_v32  ;;  %1288 = vmatprep.subr.bf16.mxu1 %v1640_v32  ;;  %v1461_v35 = vld [vmem:[%s2063_s5 + $0x18] sm:$0xff]   ;;  %v1456_v36 = vld [vmem:[%s2061_s3 + $0x20] sm:$0xff]   ;;  %v1462_v37 = vld [vmem:[%s2063_s5 + $0x10] sm:$0xff]   ;;  %vm917_vm2 = vcmask 261120   ;;  %vm964_vm3 = vcmask 130048  }
 0x149   : > { %1269 = vmatpush3.bf16.msra.mxu0 %v1453_v31  ;;  %1284 = vmatprep.mubr.msk.bf16.mxu0 %vm1641_vm0, %v1640_v32  ;;  %v1457_v38 = vld [vmem:[%s2061_s3 + $0x18] sm:$0xff]   ;;  %v1458_v39 = vld [vmem:[%s2061_s3 + $0x10] sm:$0xff]   ;;  %v1459_v40 = vld [vmem:[%s2061_s3 + $0x8] sm:$0xff]  }
 0x14a   : > { %1270 = vmatprep.subr.bf16.mxu0 %v1640_v32  ;;  %1296 = vmatprep.mubr.msk.bf16.mxu1 %vm1641_vm0, %v1640_v32  ;;  %v684_v41 = vld [vmem:[#allocation2] sm:$0xff]  ;;  %v1463_v48 = vld [vmem:[%s2063_s5 + $0x8] sm:$0xff]  }
 0x14b   : > { %1289 = vmatpush3.bf16.msra.mxu1 %v1461_v35  ;;  %v1196_v43 = vld [vmem:[%s2060_s2] ss:$0 sm:$0xff]  ;;  %v1465_v58 = vld [vmem:[%s2102_s26 + $0x8] sm:$0xff]  }
 0x14c   : > { %1290 = vmatprep.subr.bf16.mxu1 %v1640_v32  ;;  %v693_v44 = vadd.f32 %v1196_v43, %v684_v41  ;;  %v1460_v46 = vld [vmem:[%s2061_s3] sm:$0xff]  }
 0x14d   : > { %1271 = vmatpush3.bf16.msra.mxu0 %v1454_v33  ;;  %v685_v42 = vld [vmem:[#allocation2 + $0x8] sm:$0xff]  ;;  %v1464_v49 = vld [vmem:[%s2063_s5] sm:$0xff]  }
 0x14e   : > { %1272 = vmatprep.subr.bf16.mxu0 %v1640_v32  ;;  %v694_v45 = vadd.f32 %v1196_v43, %v685_v42  ;;  %v1197_v51 = vld [vmem:[%s2062_s4] ss:$0 sm:$0xff] }
 0x14f   : > { %1291 = vmatpush3.bf16.msra.mxu1 %v1462_v37  ;;  %v1466_v59 = vld [vmem:[%s2103_s14] sm:$0xff]  }
 0x150   : > { %1292 = vmatprep.subr.bf16.mxu1 %v1640_v32  ;;  %v695_v47 = vpack.c.bf16 %v694_v45, %v693_v44  ;;  %v1206_v61 = vld [vmem:[%s2104_s25] ss:$0 sm:$0xff] }
 0x151   : > { %1273 = vmatpush3.bf16.msra.mxu0 %v1455_v34  ;;  %v1467_v4 = vld [vmem:[%s2105_s24] sm:$0xff]  }
 0x152   : > { %1274 = vmatprep.subr.bf16.mxu0 %v1640_v32  ;;  %v1212_v5 = vld [vmem:[%s2106_s12] ss:$0 sm:$0xff] }
 0x153   : > { %1293 = vmatpush3.bf16.msra.mxu1 %v1463_v48  ;;  %v1218_v23 = vld [vmem:[%s2107_s15] ss:$0 sm:$0xff] }
 0x154   : > { %1294 = vmatprep.subr.bf16.mxu1 %v1640_v32 }
 0x155   : > { %1275 = vmatpush3.bf16.msra.mxu0 %v1456_v36 }
 0x156   : > { %1276 = vmatprep.subr.bf16.mxu0 %v1640_v32 }
 0x157   : > { %1295 = vmatpush3.bf16.msra.mxu1 %v1464_v49 }
 0x158   : > { %1300 = vmatprep.subr.bf16.mxu1 %v1640_v32 }
 0x159   : > { %1277 = vmatpush3.bf16.msra.mxu0 %v1457_v38 }
 0x15a   : > { %1278 = vmatprep.subr.bf16.mxu0 %v1640_v32 }
 0x15d   : > { %1279 = vmatpush3.bf16.msra.mxu0 %v1458_v39 }
 0x15e   : > { %1280 = vmatprep.subr.bf16.mxu0 %v1640_v32 }
 0x161   : > { %1281 = vmatpush3.bf16.msra.mxu0 %v1459_v40 }
 0x162   : > { %1282 = vmatprep.subr.bf16.mxu0 %v1640_v32 }
 0x165   : > { %1283 = vmatpush3.bf16.msra.mxu0 %v1460_v46 }
 0x168   : > { %1285 = vmatmul.mubr.bf16.vlgmr.msra.gmra.mxu0 %v695_v47 }
 0x228   : > { %v801_v50 = vpop.f32.mrf.mxu0 }
 0x229   : > { %v802_v54 = vadd.f32 %v1197_v51, %v801_v50 }
 0x22a   : > { %v1286_v52 = vpop.f32.mrf.mxu0 }
 0x22c   : > { %v804_v53 = vpop.f32.mrf.mxu0 }
 0x22d   : > { %v805_v55 = vadd.f32 %v1197_v51, %v804_v53 }
 0x22e   : > { %v1287_v56 = vpop.f32.mrf.mxu0 }
 0x22f   : > { %v808_v57 = vpack.c.bf16 %v805_v55, %v802_v54 }
 0x231   : > { %1297 = vmatmul.mubr.msk.bf16.vlgmr.msra.gmra.mxu1 %vm848_vm1, %v808_v57 }
 0x232   : > { %1304 = vmatprep.mubr.msk.bf16.mxu1 %vm1641_vm0, %v1640_v32  ;;  %1301 = vmatpush3.bf16.msra.mxu1 %v1465_v58 }
 0x233   : > { %1302 = vmatprep.subr.bf16.mxu1 %v1640_v32 }
 0x236   : > { %1303 = vmatpush3.bf16.msra.mxu1 %v1466_v59 }
 0x237   : > { %1308 = vmatprep.subr.bf16.mxu1 %v1640_v32 }
 0x2f1   : > { %v886_v60 = vpop.f32.mrf.mxu1 }
 0x2f2   : > { %v887_v0 = vadd.f32 %v1206_v61, %v886_v60 }
 0x2f3   : > { %v1298_v62 = vpop.f32.mrf.mxu1 }
 0x2f5   : > { %v889_v63 = vpop.f32.mrf.mxu1 }
 0x2f6   : > { %v890_v1 = vadd.f32 %v1206_v61, %v889_v63 }
 0x2f7   : > { %v1299_v2 = vpop.f32.mrf.mxu1 }
 0x2f8   : > { %v893_v3 = vpack.c.bf16 %v890_v1, %v887_v0 }
 0x2fa   : > { %1305 = vmatmul.mubr.msk.bf16.vlgmr.msra.gmra.mxu1 %vm917_vm2, %v893_v3 }
 0x2fb   : > { %1310 = vmatprep.mubr.msk.bf16.mxu1 %vm1641_vm0, %v1640_v32  ;;  %1309 = vmatpush3.bf16.msra.mxu1 %v1467_v4 }
 0x3ba   : > { %v955_v6 = vpop.f32.mrf.mxu1 }
 0x3bb   : > { %v956_v7 = vadd.f32 %v1212_v5, %v955_v6 }
 0x3bc   : > { %v1306_v8 = vpop.f32.mrf.mxu1 }
 0x3bd   : > { %v962_v9 = vmul.f32 %v956_v7, %v956_v7 }
 0x3be   : > { %v958_v10 = vpop.f32.mrf.mxu1 }
 0x3bf   : > { %v959_v11 = vadd.f32 %v1212_v5, %v958_v10  ;;  %v965_v12 = vsel %vm964_vm3, %v962_v9, 0.0 }
 0x3c0   : > { %966 = vadd.xlane.f32.xlu0 %v965_v12  ;;  %v1307_v13 = vpop.f32.mrf.mxu1 }
 0x3c1   : > { %v975_v14 = vpack.c.bf16 %v959_v11, %v956_v7  ;;  %v963_v15 = vmul.f32 %v959_v11, %v959_v11 }
 0x3c3   : > { %1311 = vmatmul.mubr.msk.bf16.vlgmr.msra.gmra.mxu1 %vm964_vm3, %v975_v14  ;;  %v968_v16 = vsel %vm964_vm3, %v963_v15, 0.0 }
 0x3c4   : > { %969 = vadd.xlane.f32.xlu0 %v968_v16 }
 0x449   : > { %v967_v17 = vpop.xlane.xlu0 %966 }
 0x44a   : > { %v971_v18 = vmax.f32 %v967_v17, 1e-24 }
 0x44c   : > { %1468 = vrsqrt.f32 %v971_v18 }
 0x44d   : > { %v970_v19 = vpop.xlane.xlu0 %969 }
 0x44e   : > { %v972_v20 = vmax.f32 %v970_v19, 1e-24 }
 0x450   : > { %1470 = vrsqrt.f32 %v972_v20 }
 0x459   : > { %v1469_v21 = vpop.eup %1468 }
 0x45d   : > { %v1471_v27 = vpop.eup %1470 }
 0x483   : > { %v1021_v22 = vpop.f32.mrf.mxu1 }
 0x484   : > { %v1028_v24 = vmul.f32 %v1469_v21, %v1021_v22 }
 0x485   : > { %v1312_v25 = vpop.f32.mrf.mxu1 }
 0x486   : > { %v1037_v26 = vadd.f32 %v1218_v23, %v1028_v24 }
 0x487   : > { %v1024_v28 = vpop.f32.mrf.mxu1 }
 0x488   : > { %1039 = vst [vmem:[%s1866_s23] sm:$0xff] %v1037_v26  ;;  %v1029_v29 = vmul.f32 %v1471_v27, %v1024_v28 }
 0x489   : > { %v1313_v30 = vpop.f32.mrf.mxu1 }
 0x48a   : > { %v1038_v31 = vadd.f32 %v1218_v23, %v1029_v29 }
 0x48c   : > { %1040 = vst [vmem:[%s1866_s23 + $0x8] sm:$0xff] %v1038_v31 }
 0x48d PF: > { %s2108_s26 = sld [smem:[#allocation12_spill]]  ;;  %s1055_s20 = sshll.u32 %s1866_s23, 4  ;;  %s1982_s20 = int_to_ptr.vmem [resolvable:$true] %s1055_s20 }
 0x48e   : > { %s2109_s30 = sld [smem:[#allocation25_spill]]  ;;  %s1986_s28 = scalar_lea.sflag [#allocation6], %s479_s11 }
 0x48f   : > { %s1498_s24 = scalar_lea.vmem %s1982_s20, 256  ;;  %s1642_s8 = smov [#allocation7]  }
 0x490   : > { %p1499_p3 = scmp.ne.s32.totalorder %s1982_s20, %s1498_s24  ;;  %s1502_s16 = sshll.u32 %s1642_s8, 4  ;;  %s1503_s16 = int_to_ptr.vmem [resolvable:$false] %s1502_s16 }
 0x491   : > { %s1504_s12 = scalar_lea.vmem %s1503_s16, 512  ;;  %p1505_p10 = scmp.lt.s32.totalorder %s1982_s20, %s1503_s16 }
 0x492   : > { %p1500_p8 = pnand %p1499_p3, %p1824_p4  ;;  %p1506_p11 = scmp.lt.s32.totalorder %s1504_s12, %s1498_s24 }
 0x493   : > { %s1226_s7 = sshll.u32 %s2108_s26, 8 }
 0x494   : > { %s1979_s25 = scalar_lea.hbm %s2109_s30, %s1226_s7  ;;  %p1501_p9 = pneg %p1500_p8 }
 0x495   : > { %p1507_p13 = por %p1506_p11, %p1505_p10 }
 0x497   : > { %p1508_p0 = pnand %p1507_p13, %p1501_p9 }
 0x499   : > { %1511 = shalt.err (!%p1508_p0)
}
 0x49a   : > { %s1512_s11 = scalar_lea.hbm %s1979_s25, 256  ;;  %s1516_s13 = scalar_lea.hbm %s2109_s30, 512 }
 0x49b   : > { %p1513_p1 = scmp.ne.s32.totalorder %s1979_s25, %s1512_s11  ;;  %p1517_p7 = scmp.lt.s32.totalorder %s1979_s25, %s2109_s30 }
 0x49c   : > { %p1518_p12 = scmp.lt.s32.totalorder %s1516_s13, %s1512_s11 }
 0x49d   : > { %p1514_p2 = pnand %p1513_p1, %p1824_p4 }
 0x49e   : > { %p1519_p3 = por %p1518_p12, %p1517_p7 }
 0x49f   : > { %p1515_p6 = pneg %p1514_p2 }
 0x4a1   : > { %p1520_p8 = pnand %p1519_p3, %p1515_p6 }
 0x4a3   : > { %1523 = shalt.err (!%p1520_p8)
}
 0x4a4   : > { %s1643_s7 = smov 128   ;;  %s1644_s6 = smov 8  }
 0x4a5   : > { %1316 = dma.vmem_to_hbm [thread:$0]  (%p1824_p4), %s1982_s20, 256, %s1979_s25, %s1986_s28, %s1643_s7, %s1643_s7, %s1644_s6  }
 0x4a6 PF: > { %p1322_p9 = scmp.ge.s32.totalorder %s1634_s29, 2  ;;  %s1070_s24 = sand.u32 1, %s1586_s17  }
 0x4a7   : > { %s1071_s8 = scalar_lea.sflag [#allocation6], %s1070_s24 }
 0x4a8   : > { %p1319_p10 = pnand %p1322_p9, %p1828_p5 }
 0x4aa   : > { %p1320_p11 = pneg %p1319_p10 }
 0x4ac   : > { %1581 = dma.done.wait (%p1320_p11), %s1071_s8, 256  }
 0x4ad   : > { %1583 = vsyncadd (%p1320_p11), %s1071_s8, 4294967040  ;;  %s27_s29 = sadd.s32 1, %s1634_s29   ;;  %s2112_s10 = sld [smem:[#allocation10_spill]] }
 0x4ae   : > { %p2014_p13 = scmp.ge.s32.totalorder %s27_s29, 6   ;;  %s2113_s19 = sld [smem:[#allocation18_spill]] }
 0x4af   : > { %s2114_s25 = sld [smem:[#allocation16_spill]]  ;;  %s2120_s17 = smov %s1590_s18 }
 0x4b0   : > { %s2115_s23 = sld [smem:[#allocation11_spill]]  ;;  %s2122_s20 = smov %s1602_s21 }
 0x4b1   : > { %s2116_s24 = sld [smem:[#allocation17_spill]]  ;;  %s2123_s21 = smov %s1606_s22 }
 0x4b2   : > { %s2117_s26 = sld [smem:[#allocation13_spill]] }
 0x4b3   : > { %s2118_s28 = sld [smem:[#allocation14_spill]]  ;;  %s2121_s18 = smov %s2112_s10 }
 0x4b4   : > { %s2119_s12 = sld [smem:[#allocation15_spill]] }
 0x4b5   : > { %s2124_s22 = smov %s2114_s25  ;;  %s2125_s25 = smov %s1626_s27 }
 0x4b6   :  { %26 = sbr.rel (!%p2014_p13) target bundleno = 17 (0x11), region = 163 }
 0x4b9   : > { %s2126_s27 = smov %s2118_s28 }
 0x4ba   : > { %s2127_s28 = smov %s2119_s12 }
 0x4bb   :  { %1076 = vsyncpa [#allocation5], 1 }
 0x4bc   :  { %1078 = vsyncpa [#allocation5 + $0x1], 1 }
 0x4bd   :  { %1079 = vsyncpa [#allocation6], 1 }
 0x4be   :  { %1081 = vsyncpa [#allocation6 + $0x1], 1 }

</bundles_post_ra>
